<compile_context>
chip_gen: v5e
topology: v5e:2x2
jax: 0.10.0
libtpu: 0.0.40
codegen_flags: <defaults>
</compile_context>

<pallas_src>
import functools

import jax
import jax.numpy as jnp
from jax import lax
from jax.experimental import pallas as pl
from jax.experimental.pallas import tpu as pltpu

_LANE = 128


def _round_up(v, m):
    return (v + m - 1) // m * m


def _vmem_tile_bytes(rows, cols, itemsize):
    """VMEM footprint of a 2-D tile after (8, 128) layout padding."""
    return _round_up(max(int(rows), 1), 8) * _round_up(max(int(cols), 1), _LANE) * itemsize


def _vmem_capacity_bytes():
    """Per-core VMEM capacity; conservative (v7x, 64 MiB) fallback if unknown."""
    try:
        info = pltpu.get_tpu_info()
        cap = getattr(info, "vmem_capacity_bytes", None)
        if cap:
            return int(cap)
    except Exception:
        pass
    return 64 << 20


def _make_critic_kernel(n_linear_layers, matmul_dtype):
    """Kernel computing the full MLP for one batch tile.

    Activation layout is [features, TILE_B] (batch on the lane axis).

    Ref order: (x, w0, b0, ..., w_{L-1}, b_{L-1}, out) with
      x:             [TILE_B, state_space]  (input dtype, cast in-kernel)
      w_i (i < L-1): [out_i, in_i]          (matmul dtype)
      b_i (i < L-1): [out_i, 1]             (f32)
      w_{L-1}:       [hidden, 1]            (f32)   -- final H -> 1 layer
      b_{L-1}:       [1, 1]                 (f32)
    """
    cast_down = jnp.dtype(matmul_dtype) != jnp.dtype(jnp.float32)

    def kernel(*refs):
        x_ref = refs[0]
        o_ref = refs[-1]
        prm = refs[1:-1]

        # Layer 0: contract the feature axis of both operands (A @ B^T on the
        # MXU), so the result is already [hidden, TILE_B] -- batch rides the
        # 128-lane axis without any HBM- or VMEM-side transpose of x.
        w0 = prm[0][...]                              # [h0, F], matmul dtype
        b0 = prm[1][...]                              # [h0, 1], f32
        x_blk = x_ref[...].astype(w0.dtype)           # [TILE_B, F]
        y = lax.dot_general(w0, x_blk, (((1,), (1,)), ((), ())),
                            preferred_element_type=jnp.float32)
        h = jnp.maximum(y + b0, 0.0)                  # f32 [h0, TILE_B]
        if cast_down:
            h = h.astype(matmul_dtype)                # halve live VMEM footprint

        # Hidden stack: Linear -> ReLU.  MXU matmul with f32 accumulation; the
        # bias add / ReLU stay in f32 (v5e's VPU has no bf16 path).
        for layer in range(1, n_linear_layers - 1):
            w = prm[2 * layer][...]                   # [out, in], matmul dtype
            b = prm[2 * layer + 1][...]               # [out, 1], f32
            y = jnp.dot(w, h, preferred_element_type=jnp.float32)
            h = jnp.maximum(y + b, 0.0)
            if cast_down:
                h = h.astype(matmul_dtype)

        # Final Linear(hidden, 1): a [1,H]x[H,B] matmul would occupy a single
        # MXU result column, so do it on the VPU/XLU instead -> lane-dense row.
        w_last = prm[-2][...]                         # [hidden, 1], f32
        b_last = prm[-1][...]                         # [1, 1], f32
        out = jnp.sum(h.astype(jnp.float32) * w_last, axis=0, keepdims=True) + b_last
        o_ref[...] = out.astype(o_ref.dtype)          # [1, TILE_B]

    return kernel


@functools.partial(
    jax.jit, static_argnames=("n_linear_layers", "tile_b", "matmul_dtype")
)
def critic_forward(x, params_flat, n_linear_layers, tile_b=2048, matmul_dtype=None):
    """x: [B, state_space]; params_flat: (w0, b0, ..., wL, bL) in PyTorch layout
    (w_i: [out_i, in_i], b_i: [out_i]). Returns [B, 1] float32."""
    batch, state_space = x.shape
    n = n_linear_layers
    hidden = params_flat[0].shape[0]

    # bf16-in / f32-accumulate matmuls whenever the hidden dim is MXU-sized;
    # tiny hidden dims keep f32 (accuracy is free there, MXU is not the limit).
    if matmul_dtype is None:
        matmul_dtype = jnp.bfloat16 if hidden >= 128 else jnp.float32
    mm_itemsize = jnp.dtype(matmul_dtype).itemsize

    # ---- Kernel-side parameter layout + specs (constant index maps -> blocks
    # stay VMEM-resident across the whole grid).
    kernel_params = []
    param_specs = []
    for layer in range(n):
        w = params_flat[2 * layer]
        b = params_flat[2 * layer + 1]
        if layer < n - 1:
            kw = w.astype(matmul_dtype)                  # [out, in]
            kb = b.reshape(-1, 1).astype(jnp.float32)    # [out, 1]
        else:
            kw = w.reshape(-1, 1).astype(jnp.float32)    # [hidden, 1]
            kb = b.reshape(1, 1).astype(jnp.float32)     # [1, 1]
        kernel_params += [kw, kb]
        param_specs += [pl.BlockSpec(kw.shape, lambda i: (0, 0)),
                        pl.BlockSpec(kb.shape, lambda i: (0, 0))]

    # ---- Batch tiling: no host-side pad (Pallas masks the ragged last block;
    # garbage columns only feed discarded outputs).  Cap the tile near half the
    # batch so the parallel grid has >= 2 steps (v7x has 2 TensorCores).
    if batch <= _LANE:
        tile = _LANE
    else:
        half = _round_up(pl.cdiv(batch, 2), _LANE)
        tile = max(_LANE, (min(int(tile_b), half) // _LANE) * _LANE)

    # ---- VMEM accounting: params and x/out tiles are double-buffered by the
    # Pallas pipeline (count them twice); activations live once.  Shrink the
    # batch tile until the estimate fits under (capacity - 24 MiB margin).
    x_itemsize = jnp.dtype(x.dtype).itemsize
    param_bytes = sum(
        _vmem_tile_bytes(p.shape[0], p.shape[1], jnp.dtype(p.dtype).itemsize)
        for p in kernel_params)

    def vmem_needed(t):
        x_tile = _vmem_tile_bytes(t, state_space, x_itemsize)
        o_tile = _vmem_tile_bytes(1, t, 4)
        act = hidden * t * (mm_itemsize + 12)      # live h + f32 temporaries
        return 2 * param_bytes + 2 * (x_tile + o_tile) + act + (4 << 20)

    vmem_cap = max(_vmem_capacity_bytes() - (24 << 20), 32 << 20)
    while tile > _LANE and vmem_needed(tile) > vmem_cap:
        tile -= _LANE
    vmem_limit = int(min(max(vmem_needed(tile), 8 << 20), vmem_cap))

    grid = (pl.cdiv(batch, tile),)

    out = pl.pallas_call(
        _make_critic_kernel(n, matmul_dtype),
        out_shape=jax.ShapeDtypeStruct((1, batch), jnp.float32),
        grid=grid,
        in_specs=[pl.BlockSpec((tile, state_space), lambda i: (i, 0))] + param_specs,
        out_specs=pl.BlockSpec((1, tile), lambda i: (0, i)),
        compiler_params=pltpu.CompilerParams(
            dimension_semantics=("parallel",),
            vmem_limit_bytes=vmem_limit,
        ),
    )(x, *kernel_params)

    return out.reshape(batch, 1)


def init_critic_params(key, state_space, num_hidden_layer=2, hidden_dim=None):
    """PyTorch-layout init mirroring nn.Linear default U(-1/sqrt(in), 1/sqrt(in)).
    Returns (w0, b0, ..., wL, bL) with w_i: [out_i, in_i], b_i: [out_i]."""
    if hidden_dim is None:
        hidden_dim = state_space * 2
    dims = [state_space] + [hidden_dim] * (num_hidden_layer + 1) + [1]

    params = []
    for i in range(len(dims) - 1):
        fan_in, fan_out = dims[i], dims[i + 1]
        key, kw, kb = jax.random.split(key, 3)
        bound = 1.0 / (fan_in ** 0.5)
        w = jax.random.uniform(kw, (fan_out, fan_in), jnp.float32, -bound, bound)
        b = jax.random.uniform(kb, (fan_out,), jnp.float32, -bound, bound)
        params.extend([w, b])
    return tuple(params)


def critic_forward_ref(x, params_flat):
    """Pure-JAX reference (PyTorch semantics: h @ W.T + b)."""
    n = len(params_flat) // 2
    h = x
    for i in range(n):
        w, b = params_flat[2 * i], params_flat[2 * i + 1]
        h = h @ w.T + b
        if i < n - 1:
            h = jnp.maximum(h, 0.0)
    return h


if __name__ == "__main__":
    # Config consistent with the module's forward:
    # state_space=8, num_hidden_layer=2, hidden_dim defaults to state_space*2=16.
    state_space = 8
    num_hidden_layer = 2

    key = jax.random.PRNGKey(0)
    key, kp = jax.random.split(key)
    params = init_critic_params(kp, state_space, num_hidden_layer)
    n_linear_layers = len(params) // 2        # = num_hidden_layer + 2 = 4

    # Small batch: single grid step, ragged (masked) block, f32 path.
    key, kx = jax.random.split(key)
    x_small = jax.random.normal(kx, (8, state_space), dtype=jnp.float32)
    ref_small = critic_forward_ref(x_small, params)
    out_small = jax.block_until_ready(critic_forward(x_small, params, n_linear_layers))
    assert out_small.shape == (8, 1), out_small.shape
    assert jnp.allclose(out_small, ref_small, atol=1e-5, rtol=1e-5), (out_small, ref_small)

    # Non-multiple-of-128 batch: exercises the >=2-step parallel grid and the
    # ragged last tile with no host-side pad/transpose of x.
    key, kx2 = jax.random.split(key)
    x_big = jax.random.normal(kx2, (300, state_space), dtype=jnp.float32)
    ref_big = critic_forward_ref(x_big, params)
    out_big = jax.block_until_ready(critic_forward(x_big, params, n_linear_layers))
    assert out_big.shape == (300, 1), out_big.shape
    assert jnp.allclose(out_big, ref_big, atol=1e-5, rtol=1e-5), (out_big, ref_big)

    # Forced bf16-in / f32-accumulate MXU path (auto-selected when hidden_dim
    # >= 128 on v5e/v6e/v7x); looser tolerance due to bf16 inputs.
    out_bf16 = jax.block_until_ready(
        critic_forward(x_small, params, n_linear_layers, matmul_dtype=jnp.bfloat16))
    assert jnp.allclose(out_bf16, ref_small, atol=5e-2, rtol=5e-2), (out_bf16, ref_small)

    print("KERNEL_OK")
</pallas_src>

<mosaic_0001>
module attributes {stable_mosaic.version = 11 : i64} {
  func.func @kernel(%arg0: i32, %arg1: memref<128x8xf32, #tpu.memory_space<vmem>>, %arg2: memref<16x8xf32, #tpu.memory_space<vmem>>, %arg3: memref<16x1xf32, #tpu.memory_space<vmem>>, %arg4: memref<16x16xf32, #tpu.memory_space<vmem>>, %arg5: memref<16x1xf32, #tpu.memory_space<vmem>>, %arg6: memref<16x16xf32, #tpu.memory_space<vmem>>, %arg7: memref<16x1xf32, #tpu.memory_space<vmem>>, %arg8: memref<16x1xf32, #tpu.memory_space<vmem>>, %arg9: memref<1x1xf32, #tpu.memory_space<vmem>>, %arg10: memref<1x128xf32, #tpu.memory_space<vmem>>) attributes {dimension_semantics = [#tpu.dimension_semantics<parallel>], iteration_bounds = array<i64: 1>, scalar_prefetch = 0 : i64, scratch_operands = 0 : i64, tpu.core_type = #tpu.core_type<tc>, window_params = [{transform_indices = @transform_0, window_bounds = array<i64: 128, 8>}, {pipeline_mode = #tpu.pipeline_mode<synchronous>, transform_indices = @transform_1, window_bounds = array<i64: 16, 8>}, {pipeline_mode = #tpu.pipeline_mode<synchronous>, transform_indices = @transform_2, window_bounds = array<i64: 16, 1>}, {pipeline_mode = #tpu.pipeline_mode<synchronous>, transform_indices = @transform_3, window_bounds = array<i64: 16, 16>}, {pipeline_mode = #tpu.pipeline_mode<synchronous>, transform_indices = @transform_4, window_bounds = array<i64: 16, 1>}, {pipeline_mode = #tpu.pipeline_mode<synchronous>, transform_indices = @transform_5, window_bounds = array<i64: 16, 16>}, {pipeline_mode = #tpu.pipeline_mode<synchronous>, transform_indices = @transform_6, window_bounds = array<i64: 16, 1>}, {pipeline_mode = #tpu.pipeline_mode<synchronous>, transform_indices = @transform_7, window_bounds = array<i64: 16, 1>}, {pipeline_mode = #tpu.pipeline_mode<synchronous>, transform_indices = @transform_8, window_bounds = array<i64: 1, 1>}, {transform_indices = @transform_9, window_bounds = array<i64: 1, 128>}]} {
    %c0 = arith.constant 0 : index
    %c0_0 = arith.constant 0 : index
    %0 = vector.load %arg2[%c0, %c0_0] : memref<16x8xf32, #tpu.memory_space<vmem>>, vector<16x8xf32>
    %c0_1 = arith.constant 0 : index
    %c0_2 = arith.constant 0 : index
    %1 = vector.load %arg3[%c0_1, %c0_2] : memref<16x1xf32, #tpu.memory_space<vmem>>, vector<16x1xf32>
    %c0_3 = arith.constant 0 : index
    %c0_4 = arith.constant 0 : index
    %2 = vector.load %arg1[%c0_3, %c0_4] : memref<128x8xf32, #tpu.memory_space<vmem>>, vector<128x8xf32>
    %cst = arith.constant dense<0.000000e+00> : vector<16x128xf32>
    %3 = tpu.matmul %0, %2, %cst {dimension_numbers = #tpu.dot_dimension_numbers<[1], [1], [0], [0], [0, 0, 1, 0], [], []>} : vector<16x8xf32>, vector<128x8xf32>, vector<16x128xf32> -> vector<16x128xf32>
    %4 = vector.broadcast %1 : vector<16x1xf32> to vector<16x128xf32>
    %5 = arith.addf %3, %4 : vector<16x128xf32>
    %cst_5 = arith.constant 0.000000e+00 : f32
    %6 = vector.broadcast %cst_5 : f32 to vector<16x128xf32>
    %7 = arith.maximumf %5, %6 : vector<16x128xf32>
    %c0_6 = arith.constant 0 : index
    %c0_7 = arith.constant 0 : index
    %8 = vector.load %arg4[%c0_6, %c0_7] : memref<16x16xf32, #tpu.memory_space<vmem>>, vector<16x16xf32>
    %c0_8 = arith.constant 0 : index
    %c0_9 = arith.constant 0 : index
    %9 = vector.load %arg5[%c0_8, %c0_9] : memref<16x1xf32, #tpu.memory_space<vmem>>, vector<16x1xf32>
    %cst_10 = arith.constant dense<0.000000e+00> : vector<16x128xf32>
    %10 = tpu.matmul %8, %7, %cst_10 {dimension_numbers = #tpu.dot_dimension_numbers<[1], [0], [0], [1], [0, 0, 1, 1], [], []>} : vector<16x16xf32>, vector<16x128xf32>, vector<16x128xf32> -> vector<16x128xf32>
    %11 = vector.broadcast %9 : vector<16x1xf32> to vector<16x128xf32>
    %12 = arith.addf %10, %11 : vector<16x128xf32>
    %cst_11 = arith.constant 0.000000e+00 : f32
    %13 = vector.broadcast %cst_11 : f32 to vector<16x128xf32>
    %14 = arith.maximumf %12, %13 : vector<16x128xf32>
    %c0_12 = arith.constant 0 : index
    %c0_13 = arith.constant 0 : index
    %15 = vector.load %arg6[%c0_12, %c0_13] : memref<16x16xf32, #tpu.memory_space<vmem>>, vector<16x16xf32>
    %c0_14 = arith.constant 0 : index
    %c0_15 = arith.constant 0 : index
    %16 = vector.load %arg7[%c0_14, %c0_15] : memref<16x1xf32, #tpu.memory_space<vmem>>, vector<16x1xf32>
    %cst_16 = arith.constant dense<0.000000e+00> : vector<16x128xf32>
    %17 = tpu.matmul %15, %14, %cst_16 {dimension_numbers = #tpu.dot_dimension_numbers<[1], [0], [0], [1], [0, 0, 1, 1], [], []>} : vector<16x16xf32>, vector<16x128xf32>, vector<16x128xf32> -> vector<16x128xf32>
    %18 = vector.broadcast %16 : vector<16x1xf32> to vector<16x128xf32>
    %19 = arith.addf %17, %18 : vector<16x128xf32>
    %cst_17 = arith.constant 0.000000e+00 : f32
    %20 = vector.broadcast %cst_17 : f32 to vector<16x128xf32>
    %21 = arith.maximumf %19, %20 : vector<16x128xf32>
    %c0_18 = arith.constant 0 : index
    %c0_19 = arith.constant 0 : index
    %22 = vector.load %arg8[%c0_18, %c0_19] : memref<16x1xf32, #tpu.memory_space<vmem>>, vector<16x1xf32>
    %c0_20 = arith.constant 0 : index
    %c0_21 = arith.constant 0 : index
    %23 = vector.load %arg9[%c0_20, %c0_21] : memref<1x1xf32, #tpu.memory_space<vmem>>, vector<1x1xf32>
    %24 = vector.broadcast %22 : vector<16x1xf32> to vector<16x128xf32>
    %25 = arith.mulf %21, %24 : vector<16x128xf32>
    %cst_22 = arith.constant dense<0.000000e+00> : vector<128xf32>
    %26 = vector.multi_reduction <add>, %25, %cst_22 [0] : vector<16x128xf32> to vector<128xf32>
    %27 = vector.shape_cast %26 : vector<128xf32> to vector<1x128xf32>
    %28 = vector.broadcast %23 : vector<1x1xf32> to vector<1x128xf32>
    %29 = arith.addf %27, %28 : vector<1x128xf32>
    %c0_23 = arith.constant 0 : index
    %c0_24 = arith.constant 0 : index
    %30 = vector.load %arg10[%c0_23, %c0_24] : memref<1x128xf32, #tpu.memory_space<vmem>>, vector<1x128xf32>
    tpu.vector_store %arg10[%c0_23, %c0_24], %29 {strides = array<i32>} : memref<1x128xf32, #tpu.memory_space<vmem>>, vector<1x128xf32>,
    return
  }
  func.func @transform_0(%arg0: i32) -> (i32, i32) {
    %c0_i32 = arith.constant 0 : i32
    %c0_i32_0 = arith.constant 0 : i32
    return %arg0, %c0_i32 : i32, i32
  }
  func.func @transform_1(%arg0: i32) -> (i32, i32) {
    %c0_i32 = arith.constant 0 : i32
    %c0_i32_0 = arith.constant 0 : i32
    %c0_i32_1 = arith.constant 0 : i32
    return %c0_i32, %c0_i32_0 : i32, i32
  }
  func.func @transform_2(%arg0: i32) -> (i32, i32) {
    %c0_i32 = arith.constant 0 : i32
    %c0_i32_0 = arith.constant 0 : i32
    %c0_i32_1 = arith.constant 0 : i32
    return %c0_i32, %c0_i32_0 : i32, i32
  }
  func.func @transform_3(%arg0: i32) -> (i32, i32) {
    %c0_i32 = arith.constant 0 : i32
    %c0_i32_0 = arith.constant 0 : i32
    %c0_i32_1 = arith.constant 0 : i32
    return %c0_i32, %c0_i32_0 : i32, i32
  }
  func.func @transform_4(%arg0: i32) -> (i32, i32) {
    %c0_i32 = arith.constant 0 : i32
    %c0_i32_0 = arith.constant 0 : i32
    %c0_i32_1 = arith.constant 0 : i32
    return %c0_i32, %c0_i32_0 : i32, i32
  }
  func.func @transform_5(%arg0: i32) -> (i32, i32) {
    %c0_i32 = arith.constant 0 : i32
    %c0_i32_0 = arith.constant 0 : i32
    %c0_i32_1 = arith.constant 0 : i32
    return %c0_i32, %c0_i32_0 : i32, i32
  }
  func.func @transform_6(%arg0: i32) -> (i32, i32) {
    %c0_i32 = arith.constant 0 : i32
    %c0_i32_0 = arith.constant 0 : i32
    %c0_i32_1 = arith.constant 0 : i32
    return %c0_i32, %c0_i32_0 : i32, i32
  }
  func.func @transform_7(%arg0: i32) -> (i32, i32) {
    %c0_i32 = arith.constant 0 : i32
    %c0_i32_0 = arith.constant 0 : i32
    %c0_i32_1 = arith.constant 0 : i32
    return %c0_i32, %c0_i32_0 : i32, i32
  }
  func.func @transform_8(%arg0: i32) -> (i32, i32) {
    %c0_i32 = arith.constant 0 : i32
    %c0_i32_0 = arith.constant 0 : i32
    %c0_i32_1 = arith.constant 0 : i32
    return %c0_i32, %c0_i32_0 : i32, i32
  }
  func.func @transform_9(%arg0: i32) -> (i32, i32) {
    %c0_i32 = arith.constant 0 : i32
    %c0_i32_0 = arith.constant 0 : i32
    return %c0_i32, %arg0 : i32, i32
  }
}

</mosaic_0001>

<bundles_post_ra>
// kernel: critic_forward.1
= control target key start
LH: loop header
LB: loop body
LE: loop exit
PB: predicated region body
PF: predicated region fallthrough
CT: control target
= control target key end

     0   :  { %s537_s0 = inlined_call_operand.vmem [shape: f32[8,8], index: 0, kind: input, shape index: {}]   ;;  %s538_s1 = inlined_call_operand.vmem [shape: f32[16,8], index: 1, kind: input, shape index: {}]   ;;  %s539_s2 = inlined_call_operand.vmem [shape: f32[16,1], index: 2, kind: input, shape index: {}]   ;;  %s540_s3 = inlined_call_operand.vmem [shape: f32[16,16], index: 3, kind: input, shape index: {}]   ;;  %s541_s4 = inlined_call_operand.vmem [shape: f32[16,1], index: 4, kind: input, shape index: {}]   ;;  %s542_s5 = inlined_call_operand.vmem [shape: f32[16,16], index: 5, kind: input, shape index: {}]   ;;  %s543_s6 = inlined_call_operand.vmem [shape: f32[16,1], index: 6, kind: input, shape index: {}]   ;;  %s544_s7 = inlined_call_operand.vmem [shape: f32[16,1], index: 7, kind: input, shape index: {}]   ;;  %s545_s8 = inlined_call_operand.<no memory space> [shape: f32[1,1], index: 8, kind: input, shape index: {}]   ;;  %s546_s9 = inlined_call_operand.hbm [shape: f32[1,8], index: 9, kind: output, shape index: {}]  }
   0x1   :  { %v14_v0 = vstv %s545_s8 }
   0x2   :  { %15 = vst [vmem:[#allocation2] sm:$0x1] %v14_v0 }
   0x3   :  { %v54_v1 = vld [vmem:[%s537_s0 + $0x78] sm:$0xff]  ;;  %vm65_vm0 = vcmask 64512   ;;  %v53_v2 = vld [vmem:[%s537_s0 + $0x70] sm:$0xff] }
   0x4   :  { %282 = vmatpush.xpose.msk.msra.mxu0 %vm65_vm0, %v54_v1  ;;  %304 = vmatpush.xpose.msk.msra.mxu3 %vm65_vm0, %v54_v1 }
   0x5   :  { %16 = vsyncpa [#allocation4], 0  ;;  %v52_v3 = vld [vmem:[%s537_s0 + $0x68] sm:$0xff]  ;;  %v51_v4 = vld [vmem:[%s537_s0 + $0x60] sm:$0xff]  ;;  %v351_v10 = vmov 0   ;;  %vm159_vm1 = vcmask 130048  }
   0x6   :  { %v50_v5 = vld [vmem:[%s537_s0 + $0x58] sm:$0xff]  ;;  %v49_v6 = vld [vmem:[%s537_s0 + $0x50] sm:$0xff]  ;;  %v48_v7 = vld [vmem:[%s537_s0 + $0x48] sm:$0xff]  ;;  %322 = vset.pattern.permute.xlu0 %v351_v10  ;;  %323 = vset.pattern.permute.xlu1 %v351_v10  ;;  %s273_s21 = sshll.u32 %s546_s9, 4  ;;  %s274_s21 = int_to_ptr.hbm [resolvable:$true] %s273_s21 }
   0x7   :  { %v38_v8 = vld [vmem:[%s539_s2 + $0x8] sm:$0xff]  ;;  %v47_v9 = vld [vmem:[%s537_s0 + $0x40] sm:$0xff]  ;;  %324 = vset.pattern.permute.xlu2 %v351_v10  ;;  %v46_v11 = vld [vmem:[%s537_s0 + $0x38] sm:$0xff] }
   0x8   :  { %283 = vmatpush.xpose.msk.msra.mxu0 %vm65_vm0, %v53_v2  ;;  %305 = vmatpush.xpose.msk.msra.mxu3 %vm65_vm0, %v53_v2  ;;  %v37_v12 = vld [vmem:[%s539_s2] sm:$0xff]  ;;  %v45_v13 = vld [vmem:[%s537_s0 + $0x30] sm:$0xff]  ;;  %v44_v14 = vld [vmem:[%s537_s0 + $0x28] sm:$0xff] }
   0x9   :  { %62 = vperm.xlu0 %322, %v38_v8   ;;  %v236_v15 = vld [vmem:[%s544_s7] sm:$0xff]  ;;  %v42_v17 = vld [vmem:[%s537_s0 + $0x18] sm:$0xff]  ;;  %v41_v18 = vld [vmem:[%s537_s0 + $0x10] sm:$0xff] }
   0xa   :  { %v43_v16 = vld [vmem:[%s537_s0 + $0x20] sm:$0xff]  ;;  %v40_v19 = vld [vmem:[%s537_s0 + $0x8] sm:$0xff] }
   0xb   :  { %v39_v20 = vld [vmem:[%s537_s0] sm:$0xff]  ;;  %v36_v22 = vld [vmem:[%s538_s1 + $0x8] sm:$0xff] }
   0xc   :  { %284 = vmatpush.xpose.msk.msra.mxu0 %vm65_vm0, %v52_v3  ;;  %306 = vmatpush.xpose.msk.msra.mxu3 %vm65_vm0, %v52_v3  ;;  %v35_v21 = vld [vmem:[%s538_s1] sm:$0xff]  ;;  %v148_v23 = vld [vmem:[%s541_s4 + $0x8] sm:$0xff] }
   0xd   :  { %156 = vperm.xlu1 %323, %v148_v23   ;;  %v147_v24 = vld [vmem:[%s541_s4] sm:$0xff]  ;;  %v237_v25 = vld [vmem:[%s544_s7 + $0x8] sm:$0xff] }
   0xe   :  { %v145_v34 = vld [vmem:[%s540_s3] sm:$0xff]  ;;  %v146_v35 = vld [vmem:[%s540_s3 + $0x8] sm:$0xff] }
   0xf   :  { %v193_v36 = vld [vmem:[%s543_s6] sm:$0xff]  ;;  %v194_v38 = vld [vmem:[%s543_s6 + $0x8] sm:$0xff] }
  0x10   :  { %285 = vmatpush.xpose.msk.msra.mxu0 %vm65_vm0, %v51_v4  ;;  %307 = vmatpush.xpose.msk.msra.mxu3 %vm65_vm0, %v51_v4  ;;  %v238_v40 = vld [vmem:[#allocation2] sm:$0x1]  ;;  %v192_v48 = vld [vmem:[%s542_s5 + $0x8] sm:$0xff] }
  0x11   :  { %57 = vperm.xlu0 %322, %v37_v12   ;;  %197 = vperm.xlu2 %324, %v193_v36   ;;  %v191_v47 = vld [vmem:[%s542_s5] sm:$0xff]  ;;  %s352_s5 = smov [#allocation3]  }
  0x12   :  { %s271_s18 = sshll.u32 %s352_s5, 4  ;;  %s272_s18 = int_to_ptr.vmem [resolvable:$true] %s271_s18 }
  0x14   :  { %286 = vmatpush.xpose.msk.msra.mxu0 %vm65_vm0, %v50_v5  ;;  %308 = vmatpush.xpose.msk.msra.mxu3 %vm65_vm0, %v50_v5 }
  0x15   :  { %151 = vperm.xlu1 %323, %v147_v24  }
  0x18   :  { %287 = vmatpush.xpose.msk.msra.mxu0 %vm65_vm0, %v49_v6  ;;  %309 = vmatpush.xpose.msk.msra.mxu3 %vm65_vm0, %v49_v6 }
  0x19   :  { %241 = vperm.xlu0 %322, %v236_v15   ;;  %202 = vperm.xlu2 %324, %v194_v38  }
  0x1c   :  { %288 = vmatpush.xpose.msk.msra.mxu0 %vm65_vm0, %v48_v7  ;;  %310 = vmatpush.xpose.msk.msra.mxu3 %vm65_vm0, %v48_v7 }
  0x1d   :  { %246 = vperm.xlu1 %323, %v237_v25  }
  0x20   :  { %289 = vmatpush.xpose.msk.msra.mxu0 %vm65_vm0, %v47_v9  ;;  %311 = vmatpush.xpose.msk.msra.mxu3 %vm65_vm0, %v47_v9 }
  0x21   :  { %260 = vperm.xlu2 %324, %v238_v40  }
  0x24   :  { %290 = vmatpush.xpose.msk.msra.mxu0 %vm65_vm0, %v46_v11  ;;  %312 = vmatpush.xpose.msk.msra.mxu3 %vm65_vm0, %v46_v11 }
  0x28   :  { %291 = vmatpush.xpose.msk.msra.mxu0 %vm65_vm0, %v45_v13  ;;  %313 = vmatpush.xpose.msk.msra.mxu3 %vm65_vm0, %v45_v13 }
  0x2c   :  { %292 = vmatpush.xpose.msk.msra.mxu0 %vm65_vm0, %v44_v14  ;;  %314 = vmatpush.xpose.msk.msra.mxu3 %vm65_vm0, %v44_v14 }
  0x30   :  { %293 = vmatpush.xpose.msk.msra.mxu0 %vm65_vm0, %v43_v16  ;;  %315 = vmatpush.xpose.msk.msra.mxu3 %vm65_vm0, %v43_v16 }
  0x34   :  { %294 = vmatpush.xpose.msk.msra.mxu0 %vm65_vm0, %v42_v17  ;;  %316 = vmatpush.xpose.msk.msra.mxu3 %vm65_vm0, %v42_v17 }
  0x38   :  { %295 = vmatpush.xpose.msk.msra.mxu0 %vm65_vm0, %v41_v18  ;;  %317 = vmatpush.xpose.msk.msra.mxu3 %vm65_vm0, %v41_v18 }
  0x3c   :  { %296 = vmatpush.xpose.msk.msra.mxu0 %vm65_vm0, %v40_v19  ;;  %318 = vmatpush.xpose.msk.msra.mxu3 %vm65_vm0, %v40_v19 }
  0x40   :  { %297 = vmatpush.xpose.msk.msra.mxu0 %vm65_vm0, %v39_v20  ;;  %319 = vmatpush.xpose.msk.msra.mxu3 %vm65_vm0, %v39_v20 }
  0x43   :  { %298 = vmatmul.msk.f32.vlgmr.msra.gmra.mxu0 %vm65_vm0, %v35_v21  ;;  %299 = vmatmul.msk.f32.vlgmr.msra.gmra.mxu3 %vm65_vm0, %v36_v22 }
  0x6b   :  { %v198_v49 = vpop.permute.xlu2 %197 }
  0x73   :  { %v203_v52 = vpop.permute.xlu2 %202 }
  0x7b   :  { %v63_v26 = vpop.permute.xlu0 %62  ;;  %v261_v2 = vpop.permute.xlu2 %260 }
  0x7c   :  { %v263_v4 = vperm.slane %v261_v2, 0 }
  0x7f   :  { %v157_v37 = vpop.permute.xlu1 %156 }
  0x83   :  { %v58_v28 = vpop.permute.xlu0 %57 }
  0x87   :  { %v152_v41 = vpop.permute.xlu1 %151 }
  0x8b   :  { %v242_v57 = vpop.permute.xlu0 %241 }
  0x8f   :  { %v247_v58 = vpop.permute.xlu1 %246 }
  0xc0   :  { %v137_v27 = vpop.f32.mrf.mxu0 }
  0xc1   :  { %v138_v30 = vadd.f32 %v137_v27, %v58_v28 }
  0xc3   :  { %v143_v33 = vmax.f32 %v138_v30, 0.0 }
  0xc6   :  { %v140_v29 = vpop.f32.mrf.mxu3 }
  0xc7   :  { %v141_v31 = vadd.f32 %v140_v29, %v63_v26 }
  0xc9   :  { %v144_v32 = vmax.f32 %v141_v31, 0.0 }
  0xcb   :  { %180 = vmatpush.msra.mxu1 %v144_v32 }
  0xcd   :  { %181 = vmatpush.msra.mxu1 %v143_v33 }
  0xce   :  { %300 = vmatmul.msk.f32.vlgmr.msra.gmra.mxu1 %vm159_vm1, %v145_v34 }
  0xd6   :  { %301 = vmatmul.msk.f32.gmra.mxu1 %vm159_vm1, %v146_v35 }
 0x14b   :  { %v183_v39 = vpop.f32.mrf.mxu1 }
 0x14c   :  { %v184_v43 = vadd.f32 %v183_v39, %v152_v41 }
 0x14e   :  { %v189_v46 = vmax.f32 %v184_v43, 0.0 }
 0x153   :  { %v186_v42 = vpop.f32.mrf.mxu1 }
 0x154   :  { %v187_v44 = vadd.f32 %v186_v42, %v157_v37 }
 0x156   :  { %v190_v45 = vmax.f32 %v187_v44, 0.0 }
 0x158   :  { %225 = vmatpush.msra.mxu2 %v190_v45 }
 0x15a   :  { %226 = vmatpush.msra.mxu2 %v189_v46 }
 0x15b   :  { %302 = vmatmul.msk.f32.vlgmr.msra.gmra.mxu2 %vm159_vm1, %v191_v47 }
 0x163   :  { %303 = vmatmul.msk.f32.gmra.mxu2 %vm159_vm1, %v192_v48 }
 0x1de   :  { %v228_v50 = vpop.f32.mrf.mxu2 }
 0x1df   :  { %v229_v51 = vadd.f32 %v228_v50, %v198_v49 }
 0x1e1   :  { %v234_v54 = vmax.f32 %v229_v51, 0.0 }
 0x1e3   :  { %v249_v59 = vmul.f32 %v242_v57, %v234_v54 }
 0x1e6   :  { %v231_v53 = vpop.f32.mrf.mxu2 }
 0x1e7   :  { %v232_v55 = vadd.f32 %v231_v53, %v203_v52 }
 0x1e9   :  { %v235_v56 = vmax.f32 %v232_v55, 0.0 }
 0x1eb   :  { %v250_v60 = vmul.f32 %v247_v58, %v235_v56 }
 0x1ed   :  { %v251_v61 = vadd.f32 %v250_v60, %v249_v59 }
 0x1ef   :  { %v252_v62 = vrot.slane %v251_v61, 4 }
 0x1f1   :  { %v253_v63 = vadd.f32 %v252_v62, %v251_v61 }
 0x1f3   :  { %v254_v0 = vrot.slane %v253_v63, 2 }
 0x1f5   :  { %v255_v1 = vadd.f32 %v254_v0, %v253_v63 }
 0x1f7   :  { %v256_v3 = vrot.slane %v255_v1, 1 }
 0x1f9   :  { %v257_v5 = vadd.f32 %v256_v3, %v255_v1 }
 0x1fb   :  { %v264_v6 = vadd.f32 %v263_v4, %v257_v5 }
 0x1fd   :  { %265 = vst [vmem:[#allocation3] sm:$0x1] %v264_v6 }
 0x1fe   :  { %276 = dma.vmem_to_hbm [thread:$0]  %s272_s18, 16, %s274_s21, [#allocation4]  }
 0x1ff   :  { %349 = dma.done.wait [#allocation4], 16  }
 0x200   :  { %350 = vsyncadd [#allocation4], 4294967280 }
 0x201   :  { %281 = vsyncpa [#allocation4], 1 }

</bundles_post_ra>
